<compile_context>
chip_gen: v5e
topology: v5e:2x2
jax: 0.10.0
libtpu: 0.0.40
codegen_flags: <defaults>
</compile_context>

<pallas_src>
import functools

import jax
import jax.numpy as jnp
import numpy as np
from jax.experimental import pallas as pl
from jax.experimental.pallas import tpu as pltpu


# ----------------------------------------------------------------------------
# In-kernel helpers
# ----------------------------------------------------------------------------
def _conv1x1_chunk(w_cols, xc):
    """1x1 conv on one 128-lane chunk as Cin broadcast-FMAs on the VPU.

    w_cols: list of (Cout, 1) f32 columns (hoisted out of the chunk loop),
    xc: (Cin, 128) f32 -> (Cout, 128) f32.
    """
    z = w_cols[0] * xc[0:1, :]
    for i in range(1, len(w_cols)):          # static unroll, Cin is tiny
        z = z + w_cols[i] * xc[i:i + 1, :]
    return z


# ----------------------------------------------------------------------------
# FAST PATH: one fused kernel (z kept in VMEM scratch, single HBM read of x)
# ----------------------------------------------------------------------------
def _fused_small_kernel(x_ref, w_ref, gamma_ref, beta_ref, o_ref,
                        z_ref, sum_ref, sumsq_ref, *, count, eps):
    n, cin, hw_p = x_ref.shape
    w = w_ref[...].astype(jnp.float32)
    w_cols = [w[:, i:i + 1] for i in range(cin)]
    n_chunks = hw_p // 128

    sum_ref[...] = jnp.zeros_like(sum_ref)
    sumsq_ref[...] = jnp.zeros_like(sumsq_ref)

    # Phase 1: z = conv1x1(x) into VMEM scratch + lane-dense stat partials.
    for bi in range(n):                      # static unroll, n is small here
        def p1_body(c, carry, bi=bi):
            off = pl.multiple_of(c * 128, 128)
            xc = x_ref[bi, :, pl.ds(off, 128)].astype(jnp.float32)
            zc = _conv1x1_chunk(w_cols, xc)
            z_ref[bi, :, pl.ds(off, 128)] = zc
            sum_ref[...] += zc
            sumsq_ref[...] += zc * zc
            return carry
        jax.lax.fori_loop(0, n_chunks, p1_body, 0)

    # Fold batch stats -> per-channel scale/bias (one cross-lane reduce,
    # 8-lane EUP rsqrt) entirely in-kernel: no tiny intervening XLA ops.
    s = jnp.sum(sum_ref[...], axis=1, keepdims=True)       # (Cout, 1)
    ss = jnp.sum(sumsq_ref[...], axis=1, keepdims=True)    # (Cout, 1)
    inv_count = 1.0 / count
    mean = s * inv_count
    var = jnp.maximum(ss * inv_count - mean * mean, 0.0)
    inv_std = jax.lax.rsqrt(var + eps)
    scale = gamma_ref[...].astype(jnp.float32) * inv_std
    bias = beta_ref[...].astype(jnp.float32) - mean * scale

    # Phase 2: out = relu(z * scale + bias) without re-reading x from HBM.
    for bi in range(n):
        def p2_body(c, carry, bi=bi):
            off = pl.multiple_of(c * 128, 128)
            zc = z_ref[bi, :, pl.ds(off, 128)]
            y = jnp.maximum(zc * scale + bias, 0.0)
            o_ref[bi, :, pl.ds(off, 128)] = y.astype(o_ref.dtype)
            return carry
        jax.lax.fori_loop(0, n_chunks, p2_body, 0)


# ----------------------------------------------------------------------------
# LARGE PATH pass 1: per-batch lane-dense sum / sum-of-squares of z
# (output blocks revisited along the tile axis only -> batch axis can be
#  "parallel" for v7x megacore)
# ----------------------------------------------------------------------------
def _bn_stats_kernel(x_ref, w_ref, sum_ref, sumsq_ref):
    @pl.when(pl.program_id(1) == 0)
    def _init():
        sum_ref[...] = jnp.zeros_like(sum_ref)
        sumsq_ref[...] = jnp.zeros_like(sumsq_ref)

    w = w_ref[...].astype(jnp.float32)
    w_cols = [w[:, i:i + 1] for i in range(w.shape[1])]
    n_chunks = x_ref.shape[-1] // 128

    def body(c, carry):
        off = pl.multiple_of(c * 128, 128)
        xc = x_ref[:, pl.ds(off, 128)].astype(jnp.float32)   # (Cin, 128)
        zc = _conv1x1_chunk(w_cols, xc)                      # (Cout, 128)
        sum_ref[...] += zc          # plain vadds into lane-dense accumulators
        sumsq_ref[...] += zc * zc   # (no per-tile XLU cross-lane reduce)
        return carry

    jax.lax.fori_loop(0, n_chunks, body, 0)


# ----------------------------------------------------------------------------
# LARGE PATH pass 2: out = relu(z * scale + bias), chunked, lane-dense stores
# ----------------------------------------------------------------------------
def _bn_apply_relu_kernel(x_ref, w_ref, scale_ref, bias_ref, o_ref):
    w = w_ref[...].astype(jnp.float32)
    w_cols = [w[:, i:i + 1] for i in range(w.shape[1])]
    scale = scale_ref[...]
    bias = bias_ref[...]
    n_chunks = x_ref.shape[-1] // 128

    def body(c, carry):
        off = pl.multiple_of(c * 128, 128)
        xc = x_ref[:, pl.ds(off, 128)].astype(jnp.float32)
        zc = _conv1x1_chunk(w_cols, xc)
        y = jnp.maximum(zc * scale + bias, 0.0)
        o_ref[:, pl.ds(off, 128)] = y.astype(o_ref.dtype)    # full-width vst
        return carry

    jax.lax.fori_loop(0, n_chunks, body, 0)


# ----------------------------------------------------------------------------
# Tiling helpers
# ----------------------------------------------------------------------------
_TILE_BYTE_BUDGET = 24 * 1024 * 1024      # fits v7x 64MiB VMEM (32MiB scoped)
_VMEM_LIMIT = 32 * 1024 * 1024


def _round_up(v, m):
    return -(-v // m) * m


def _choose_tiling(hw, cin, cout, x_bytes, o_bytes, max_hw_tile):
    """Pick (hw_tile, hw_pad): hw_tile is 128-aligned and its double-buffered
    streamed-block footprint stays under the byte budget; hw_pad is the padded
    spatial extent (multiple of hw_tile)."""
    hw128 = _round_up(hw, 128)
    per_lane = 2 * (cin * x_bytes + cout * o_bytes) + 8
    cap = min(int(max_hw_tile), _TILE_BYTE_BUDGET // per_lane)
    cap = max(128, (cap // 128) * 128)
    if hw128 <= cap:
        return hw128, hw128
    # Prefer a large 128-aligned divisor of hw128 (no extra padding).
    t = cap
    while t >= max(128, cap // 2):
        if hw128 % t == 0:
            return t, hw128
        t -= 128
    # Otherwise pad up to a multiple of the cap (at most one extra tile).
    return cap, _round_up(hw128, cap)


# ----------------------------------------------------------------------------
# Wrapper
# ----------------------------------------------------------------------------
def convbnrelu_forward(x, conv_w, bn_gamma, bn_beta, *,
                       kernel_size=1, padding=0, stride=1, groups=1, eps=1e-5,
                       max_hw_tile=64 * 1024,
                       fastpath_vmem_bytes=16 * 1024 * 1024,
                       force_two_pass=False):
    """Forward of convbnrelu_block with its defaults (1x1 conv, no bias,
    train-mode BatchNorm2d, ReLU).  x: (N, Cin, H, W) NCHW -> (N, Cout, H, W).
    Output dtype matches x (no hidden f32 upcast of the streamed tensors)."""
    # TODO(synk): general kernel_size/padding/stride/groups would need an
    # im2col path; only the module defaults (1x1, pad=0, stride=1, groups=1)
    # are fused here.
    assert kernel_size == 1 and padding == 0 and stride == 1 and groups == 1

    n, cin, h, w_sp = x.shape
    cout = conv_w.shape[0]
    hw = h * w_sp
    hw128 = _round_up(hw, 128)
    count = float(n * hw)                      # true count (ignores lane pad)
    out_dtype = x.dtype
    x_bytes = x.dtype.itemsize
    o_bytes = jnp.dtype(out_dtype).itemsize

    w2 = conv_w.reshape(cout, cin)
    x3 = x.reshape(n, cin, hw)                 # free reshape, stays NCHW

    # ---- FAST PATH: everything (x, z, out) fits a conservative VMEM budget.
    fast_bytes = (2 * n * hw128 * (cin * x_bytes + cout * o_bytes)
                  + n * cout * hw128 * 4 + 4 * cout * 128 * 4 + 4096)
    use_fast = ((not force_two_pass) and n <= 32
                and fast_bytes <= fastpath_vmem_bytes)

    if use_fast:
        hw_pad = hw128
        if hw_pad != hw:
            x3 = jnp.pad(x3, ((0, 0), (0, 0), (0, hw_pad - hw)))
        gamma2 = bn_gamma.astype(jnp.float32).reshape(cout, 1)
        beta2 = bn_beta.astype(jnp.float32).reshape(cout, 1)
        kern = functools.partial(_fused_small_kernel, count=count, eps=eps)
        out3 = pl.pallas_call(
            kern,
            out_shape=jax.ShapeDtypeStruct((n, cout, hw_pad), out_dtype),
            grid=(1,),
            in_specs=[pl.BlockSpec((n, cin, hw_pad), lambda i: (0, 0, 0)),
                      pl.BlockSpec((cout, cin), lambda i: (0, 0)),
                      pl.BlockSpec((cout, 1), lambda i: (0, 0)),
                      pl.BlockSpec((cout, 1), lambda i: (0, 0))],
            out_specs=pl.BlockSpec((n, cout, hw_pad), lambda i: (0, 0, 0)),
            scratch_shapes=[pltpu.VMEM((n, cout, hw_pad), jnp.float32),
                            pltpu.VMEM((cout, 128), jnp.float32),
                            pltpu.VMEM((cout, 128), jnp.float32)],
            compiler_params=pltpu.CompilerParams(
                dimension_semantics=("arbitrary",),
                vmem_limit_bytes=_VMEM_LIMIT),
            cost_estimate=pl.CostEstimate(
                flops=int(2 * count * cin * cout + 6 * count * cout),
                transcendentals=cout,
                bytes_accessed=int(n * hw_pad * (cin * x_bytes
                                                 + cout * o_bytes))),
        )(x3, w2, gamma2, beta2)
    else:
        # ---- LARGE PATH: two passes with big lane-dense tiles --------------
        hw_tile, hw_pad = _choose_tiling(hw, cin, cout, x_bytes, o_bytes,
                                         max_hw_tile)
        if hw_pad != hw:
            x3 = jnp.pad(x3, ((0, 0), (0, 0), (0, hw_pad - hw)))
        n_tiles = hw_pad // hw_tile

        x_spec = pl.BlockSpec((None, cin, hw_tile), lambda b, t: (b, 0, t))
        w_spec = pl.BlockSpec((cout, cin), lambda b, t: (0, 0))
        stat_spec = pl.BlockSpec((None, cout, 128), lambda b, t: (b, 0, 0))

        # pass 1: per-batch lane-dense partial stats of z = conv1x1(x)
        psum, psumsq = pl.pallas_call(
            _bn_stats_kernel,
            out_shape=(jax.ShapeDtypeStruct((n, cout, 128), jnp.float32),
                       jax.ShapeDtypeStruct((n, cout, 128), jnp.float32)),
            grid=(n, n_tiles),
            in_specs=[x_spec, w_spec],
            out_specs=(stat_spec, stat_spec),
            compiler_params=pltpu.CompilerParams(
                dimension_semantics=("parallel", "arbitrary"),
                vmem_limit_bytes=_VMEM_LIMIT),
            cost_estimate=pl.CostEstimate(
                flops=int(2 * count * cin * cout + 3 * count * cout),
                transcendentals=0,
                bytes_accessed=int(n * hw_pad * cin * x_bytes)),
        )(x3, w2)

        # tiny (Cout,) math: reduce partials, fold BN into scale/bias
        sum_z = jnp.sum(psum, axis=(0, 2))
        sumsq_z = jnp.sum(psumsq, axis=(0, 2))
        mean = sum_z / count
        var = jnp.maximum(sumsq_z / count - mean * mean, 0.0)
        inv_std = jax.lax.rsqrt(var + eps)
        scale1 = bn_gamma.astype(jnp.float32) * inv_std
        bias1 = bn_beta.astype(jnp.float32) - mean * scale1
        scale = scale1.reshape(cout, 1)
        bias = bias1.reshape(cout, 1)
        vec_spec = pl.BlockSpec((cout, 1), lambda b, t: (0, 0))

        # pass 2: out = relu(z * scale + bias), megacore-parallel
        out3 = pl.pallas_call(
            _bn_apply_relu_kernel,
            out_shape=jax.ShapeDtypeStruct((n, cout, hw_pad), out_dtype),
            grid=(n, n_tiles),
            in_specs=[x_spec, w_spec, vec_spec, vec_spec],
            out_specs=pl.BlockSpec((None, cout, hw_tile),
                                   lambda b, t: (b, 0, t)),
            compiler_params=pltpu.CompilerParams(
                dimension_semantics=("parallel", "parallel"),
                vmem_limit_bytes=_VMEM_LIMIT),
            cost_estimate=pl.CostEstimate(
                flops=int(2 * count * cin * cout + 3 * count * cout),
                transcendentals=0,
                bytes_accessed=int(n * hw_pad * (cin * x_bytes
                                                 + cout * o_bytes))),
        )(x3, w2, scale, bias)

    if hw_pad != hw:
        out3 = out3[:, :, :hw]
    return out3.reshape(n, cout, h, w_sp)


# ----------------------------------------------------------------------------
# Pure-JAX reference (PyTorch forward in train mode: biased batch-stat BN)
# ----------------------------------------------------------------------------
def _reference(x, conv_w, gamma, beta, *, padding=0, stride=1, eps=1e-5):
    z = jax.lax.conv_general_dilated(
        x, conv_w, window_strides=(stride, stride),
        padding=[(padding, padding), (padding, padding)],
        dimension_numbers=("NCHW", "OIHW", "NCHW"))
    mean = jnp.mean(z, axis=(0, 2, 3), keepdims=True)
    var = jnp.mean((z - mean) ** 2, axis=(0, 2, 3), keepdims=True)
    y = gamma[None, :, None, None] * (z - mean) * jax.lax.rsqrt(var + eps) \
        + beta[None, :, None, None]
    return jnp.maximum(y, 0.0)


if __name__ == "__main__":
    # Module config: convbnrelu_block(in_planes=4, out_planes=8) with defaults
    # kernel_size=1, padding=0, stride=1, groups=1, usebn=True, relu=nn.ReLU.
    key = jax.random.PRNGKey(0)
    k1, k2, k3 = jax.random.split(key, 3)

    def make_inputs(k, n, cin, cout, h, w):
        kx, kw, kg, kb = jax.random.split(k, 4)
        x = jax.random.normal(kx, (n, cin, h, w), dtype=jnp.float32)
        conv_w = jax.random.normal(kw, (cout, cin, 1, 1), dtype=jnp.float32) \
            * (1.0 / np.sqrt(cin))
        gamma = 1.0 + 0.1 * jax.random.normal(kg, (cout,), dtype=jnp.float32)
        beta = 0.1 * jax.random.normal(kb, (cout,), dtype=jnp.float32)
        return x, conv_w, gamma, beta

    fwd = jax.jit(convbnrelu_forward)

    # 1) 16x16 map -> fully fused single-call VMEM-resident path.
    x, cw, g, b = make_inputs(k1, 2, 4, 8, 16, 16)
    out = jax.block_until_ready(fwd(x, cw, g, b))
    ref = _reference(x, cw, g, b)
    np.testing.assert_allclose(np.asarray(out), np.asarray(ref),
                               rtol=1e-4, atol=1e-4)

    # 2) Force the two-pass large-map path (2x2 grid, accumulation across
    #    tiles and per-batch partial stats).
    x, cw, g, b = make_inputs(k2, 2, 4, 8, 32, 32)
    fwd2 = jax.jit(functools.partial(convbnrelu_forward,
                                     force_two_pass=True, max_hw_tile=512))
    out = jax.block_until_ready(fwd2(x, cw, g, b))
    ref = _reference(x, cw, g, b)
    np.testing.assert_allclose(np.asarray(out), np.asarray(ref),
                               rtol=1e-4, atol=1e-4)

    # 3) Non-128-multiple spatial size (12x12 = 144) -> lane-padding path.
    x, cw, g, b = make_inputs(k3, 2, 4, 8, 12, 12)
    out = jax.block_until_ready(fwd(x, cw, g, b))
    ref = _reference(x, cw, g, b)
    np.testing.assert_allclose(np.asarray(out), np.asarray(ref),
                               rtol=1e-4, atol=1e-4)

    print("KERNEL_OK")
</pallas_src>

<mosaic_0001>
module attributes {stable_mosaic.version = 11 : i64} {
  func.func @_fused_small_kernel(%arg0: i32, %arg1: memref<2x4x256xf32, #tpu.memory_space<vmem>>, %arg2: memref<8x4xf32, #tpu.memory_space<vmem>>, %arg3: memref<8x1xf32, #tpu.memory_space<vmem>>, %arg4: memref<8x1xf32, #tpu.memory_space<vmem>>, %arg5: memref<2x8x256xf32, #tpu.memory_space<vmem>>, %arg6: memref<2x8x256xf32, #tpu.memory_space<vmem>>, %arg7: memref<8x128xf32, #tpu.memory_space<vmem>>, %arg8: memref<8x128xf32, #tpu.memory_space<vmem>>) attributes {dimension_semantics = [#tpu.dimension_semantics<arbitrary>], iteration_bounds = array<i64: 1>, scalar_prefetch = 0 : i64, scratch_operands = 3 : i64, tpu.core_type = #tpu.core_type<tc>, window_params = [{pipeline_mode = #tpu.pipeline_mode<synchronous>, transform_indices = @transform_0, window_bounds = array<i64: 2, 4, 256>}, {pipeline_mode = #tpu.pipeline_mode<synchronous>, transform_indices = @transform_1, window_bounds = array<i64: 8, 4>}, {pipeline_mode = #tpu.pipeline_mode<synchronous>, transform_indices = @transform_2, window_bounds = array<i64: 8, 1>}, {pipeline_mode = #tpu.pipeline_mode<synchronous>, transform_indices = @transform_3, window_bounds = array<i64: 8, 1>}, {pipeline_mode = #tpu.pipeline_mode<synchronous>, transform_indices = @transform_4, window_bounds = array<i64: 2, 8, 256>}]} {
    %c0 = arith.constant 0 : index
    %c0_0 = arith.constant 0 : index
    %0 = vector.load %arg2[%c0, %c0_0] : memref<8x4xf32, #tpu.memory_space<vmem>>, vector<8x4xf32>
    %1 = vector.extract_strided_slice %0 {offsets = [0, 0], sizes = [8, 1], strides = [1, 1]} : vector<8x4xf32> to vector<8x1xf32>
    %2 = vector.extract_strided_slice %0 {offsets = [0, 1], sizes = [8, 1], strides = [1, 1]} : vector<8x4xf32> to vector<8x1xf32>
    %3 = vector.extract_strided_slice %0 {offsets = [0, 2], sizes = [8, 1], strides = [1, 1]} : vector<8x4xf32> to vector<8x1xf32>
    %4 = vector.extract_strided_slice %0 {offsets = [0, 3], sizes = [8, 1], strides = [1, 1]} : vector<8x4xf32> to vector<8x1xf32>
    %cst = arith.constant 0.000000e+00 : f32
    %5 = vector.broadcast %cst : f32 to vector<8x128xf32>
    %c0_1 = arith.constant 0 : index
    %c0_2 = arith.constant 0 : index
    %6 = vector.load %arg7[%c0_1, %c0_2] : memref<8x128xf32, #tpu.memory_space<vmem>>, vector<8x128xf32>
    tpu.vector_store %arg7[%c0_1, %c0_2], %5 {strides = array<i32>} : memref<8x128xf32, #tpu.memory_space<vmem>>, vector<8x128xf32>,
    %cst_3 = arith.constant 0.000000e+00 : f32
    %7 = vector.broadcast %cst_3 : f32 to vector<8x128xf32>
    %c0_4 = arith.constant 0 : index
    %c0_5 = arith.constant 0 : index
    %8 = vector.load %arg8[%c0_4, %c0_5] : memref<8x128xf32, #tpu.memory_space<vmem>>, vector<8x128xf32>
    tpu.vector_store %arg8[%c0_4, %c0_5], %7 {strides = array<i32>} : memref<8x128xf32, #tpu.memory_space<vmem>>, vector<8x128xf32>,
    %c0_i32 = arith.constant 0 : i32
    %c2_i32 = arith.constant 2 : i32
    %9 = arith.addi %c0_i32, %c2_i32 : i32
    %c1_i32 = arith.constant 1 : i32
    scf.for %arg9 = %c0_i32 to %9 step %c1_i32  : i32 {
      %c128_i32 = arith.constant 128 : i32
      %35 = arith.muli %arg9, %c128_i32 : i32
      %36 = tpu.assume_multiple %35, 128 : i32
      %c0_33 = arith.constant 0 : index
      %c0_34 = arith.constant 0 : index
      %37 = arith.index_cast %36 : i32 to index
      %38 = vector.load %arg1[%c0_33, %c0_34, %37] : memref<2x4x256xf32, #tpu.memory_space<vmem>>, vector<1x4x128xf32>
      %39 = vector.shape_cast %38 : vector<1x4x128xf32> to vector<4x128xf32>
      %40 = vector.extract_strided_slice %39 {offsets = [0, 0], sizes = [1, 128], strides = [1, 1]} : vector<4x128xf32> to vector<1x128xf32>
      %41 = vector.broadcast %1 : vector<8x1xf32> to vector<8x128xf32>
      %42 = vector.broadcast %40 : vector<1x128xf32> to vector<8x128xf32>
      %43 = arith.mulf %41, %42 : vector<8x128xf32>
      %44 = vector.extract_strided_slice %39 {offsets = [1, 0], sizes = [1, 128], strides = [1, 1]} : vector<4x128xf32> to vector<1x128xf32>
      %45 = vector.broadcast %2 : vector<8x1xf32> to vector<8x128xf32>
      %46 = vector.broadcast %44 : vector<1x128xf32> to vector<8x128xf32>
      %47 = arith.mulf %45, %46 : vector<8x128xf32>
      %48 = arith.addf %43, %47 : vector<8x128xf32>
      %49 = vector.extract_strided_slice %39 {offsets = [2, 0], sizes = [1, 128], strides = [1, 1]} : vector<4x128xf32> to vector<1x128xf32>
      %50 = vector.broadcast %3 : vector<8x1xf32> to vector<8x128xf32>
      %51 = vector.broadcast %49 : vector<1x128xf32> to vector<8x128xf32>
      %52 = arith.mulf %50, %51 : vector<8x128xf32>
      %53 = arith.addf %48, %52 : vector<8x128xf32>
      %54 = vector.extract_strided_slice %39 {offsets = [3, 0], sizes = [1, 128], strides = [1, 1]} : vector<4x128xf32> to vector<1x128xf32>
      %55 = vector.broadcast %4 : vector<8x1xf32> to vector<8x128xf32>
      %56 = vector.broadcast %54 : vector<1x128xf32> to vector<8x128xf32>
      %57 = arith.mulf %55, %56 : vector<8x128xf32>
      %58 = arith.addf %53, %57 : vector<8x128xf32>
      %c0_35 = arith.constant 0 : index
      %c0_36 = arith.constant 0 : index
      %59 = arith.index_cast %36 : i32 to index
      %60 = vector.load %arg6[%c0_35, %c0_36, %59] : memref<2x8x256xf32, #tpu.memory_space<vmem>>, vector<1x8x128xf32>
      %61 = vector.shape_cast %60 : vector<1x8x128xf32> to vector<8x128xf32>
      %62 = vector.shape_cast %58 : vector<8x128xf32> to vector<1x8x128xf32>
      tpu.vector_store %arg6[%c0_35, %c0_36, %59], %62 {strides = array<i32>} : memref<2x8x256xf32, #tpu.memory_space<vmem>>, vector<1x8x128xf32>,
      %c0_37 = arith.constant 0 : index
      %c0_38 = arith.constant 0 : index
      %63 = vector.load %arg7[%c0_37, %c0_38] : memref<8x128xf32, #tpu.memory_space<vmem>>, vector<8x128xf32>
      %64 = arith.addf %63, %58 : vector<8x128xf32>
      %c0_39 = arith.constant 0 : index
      %c0_40 = arith.constant 0 : index
      %65 = vector.load %arg7[%c0_39, %c0_40] : memref<8x128xf32, #tpu.memory_space<vmem>>, vector<8x128xf32>
      tpu.vector_store %arg7[%c0_39, %c0_40], %64 {strides = array<i32>} : memref<8x128xf32, #tpu.memory_space<vmem>>, vector<8x128xf32>,
      %c0_41 = arith.constant 0 : index
      %c0_42 = arith.constant 0 : index
      %66 = vector.load %arg8[%c0_41, %c0_42] : memref<8x128xf32, #tpu.memory_space<vmem>>, vector<8x128xf32>
      %67 = arith.mulf %58, %58 : vector<8x128xf32>
      %68 = arith.addf %66, %67 : vector<8x128xf32>
      %c0_43 = arith.constant 0 : index
      %c0_44 = arith.constant 0 : index
      %69 = vector.load %arg8[%c0_43, %c0_44] : memref<8x128xf32, #tpu.memory_space<vmem>>, vector<8x128xf32>
      tpu.vector_store %arg8[%c0_43, %c0_44], %68 {strides = array<i32>} : memref<8x128xf32, #tpu.memory_space<vmem>>, vector<8x128xf32>,
    }
    %c2_i32_6 = arith.constant 2 : i32
    %c0_i32_7 = arith.constant 0 : i32
    %c2_i32_8 = arith.constant 2 : i32
    %10 = arith.addi %c0_i32_7, %c2_i32_8 : i32
    %c1_i32_9 = arith.constant 1 : i32
    scf.for %arg9 = %c0_i32_7 to %10 step %c1_i32_9  : i32 {
      %c128_i32 = arith.constant 128 : i32
      %35 = arith.muli %arg9, %c128_i32 : i32
      %36 = tpu.assume_multiple %35, 128 : i32
      %c1 = arith.constant 1 : index
      %c0_33 = arith.constant 0 : index
      %37 = arith.index_cast %36 : i32 to index
      %38 = vector.load %arg1[%c1, %c0_33, %37] : memref<2x4x256xf32, #tpu.memory_space<vmem>>, vector<1x4x128xf32>
      %39 = vector.shape_cast %38 : vector<1x4x128xf32> to vector<4x128xf32>
      %40 = vector.extract_strided_slice %39 {offsets = [0, 0], sizes = [1, 128], strides = [1, 1]} : vector<4x128xf32> to vector<1x128xf32>
      %41 = vector.broadcast %1 : vector<8x1xf32> to vector<8x128xf32>
      %42 = vector.broadcast %40 : vector<1x128xf32> to vector<8x128xf32>
      %43 = arith.mulf %41, %42 : vector<8x128xf32>
      %44 = vector.extract_strided_slice %39 {offsets = [1, 0], sizes = [1, 128], strides = [1, 1]} : vector<4x128xf32> to vector<1x128xf32>
      %45 = vector.broadcast %2 : vector<8x1xf32> to vector<8x128xf32>
      %46 = vector.broadcast %44 : vector<1x128xf32> to vector<8x128xf32>
      %47 = arith.mulf %45, %46 : vector<8x128xf32>
      %48 = arith.addf %43, %47 : vector<8x128xf32>
      %49 = vector.extract_strided_slice %39 {offsets = [2, 0], sizes = [1, 128], strides = [1, 1]} : vector<4x128xf32> to vector<1x128xf32>
      %50 = vector.broadcast %3 : vector<8x1xf32> to vector<8x128xf32>
      %51 = vector.broadcast %49 : vector<1x128xf32> to vector<8x128xf32>
      %52 = arith.mulf %50, %51 : vector<8x128xf32>
      %53 = arith.addf %48, %52 : vector<8x128xf32>
      %54 = vector.extract_strided_slice %39 {offsets = [3, 0], sizes = [1, 128], strides = [1, 1]} : vector<4x128xf32> to vector<1x128xf32>
      %55 = vector.broadcast %4 : vector<8x1xf32> to vector<8x128xf32>
      %56 = vector.broadcast %54 : vector<1x128xf32> to vector<8x128xf32>
      %57 = arith.mulf %55, %56 : vector<8x128xf32>
      %58 = arith.addf %53, %57 : vector<8x128xf32>
      %c1_34 = arith.constant 1 : index
      %c0_35 = arith.constant 0 : index
      %59 = arith.index_cast %36 : i32 to index
      %60 = vector.load %arg6[%c1_34, %c0_35, %59] : memref<2x8x256xf32, #tpu.memory_space<vmem>>, vector<1x8x128xf32>
      %61 = vector.shape_cast %60 : vector<1x8x128xf32> to vector<8x128xf32>
      %62 = vector.shape_cast %58 : vector<8x128xf32> to vector<1x8x128xf32>
      tpu.vector_store %arg6[%c1_34, %c0_35, %59], %62 {strides = array<i32>} : memref<2x8x256xf32, #tpu.memory_space<vmem>>, vector<1x8x128xf32>,
      %c0_36 = arith.constant 0 : index
      %c0_37 = arith.constant 0 : index
      %63 = vector.load %arg7[%c0_36, %c0_37] : memref<8x128xf32, #tpu.memory_space<vmem>>, vector<8x128xf32>
      %64 = arith.addf %63, %58 : vector<8x128xf32>
      %c0_38 = arith.constant 0 : index
      %c0_39 = arith.constant 0 : index
      %65 = vector.load %arg7[%c0_38, %c0_39] : memref<8x128xf32, #tpu.memory_space<vmem>>, vector<8x128xf32>
      tpu.vector_store %arg7[%c0_38, %c0_39], %64 {strides = array<i32>} : memref<8x128xf32, #tpu.memory_space<vmem>>, vector<8x128xf32>,
      %c0_40 = arith.constant 0 : index
      %c0_41 = arith.constant 0 : index
      %66 = vector.load %arg8[%c0_40, %c0_41] : memref<8x128xf32, #tpu.memory_space<vmem>>, vector<8x128xf32>
      %67 = arith.mulf %58, %58 : vector<8x128xf32>
      %68 = arith.addf %66, %67 : vector<8x128xf32>
      %c0_42 = arith.constant 0 : index
      %c0_43 = arith.constant 0 : index
      %69 = vector.load %arg8[%c0_42, %c0_43] : memref<8x128xf32, #tpu.memory_space<vmem>>, vector<8x128xf32>
      tpu.vector_store %arg8[%c0_42, %c0_43], %68 {strides = array<i32>} : memref<8x128xf32, #tpu.memory_space<vmem>>, vector<8x128xf32>,
    }
    %c2_i32_10 = arith.constant 2 : i32
    %c0_11 = arith.constant 0 : index
    %c0_12 = arith.constant 0 : index
    %11 = vector.load %arg7[%c0_11, %c0_12] : memref<8x128xf32, #tpu.memory_space<vmem>>, vector<8x128xf32>
    %cst_13 = arith.constant dense<0.000000e+00> : vector<8xf32>
    %12 = vector.multi_reduction <add>, %11, %cst_13 [1] : vector<8x128xf32> to vector<8xf32>
    %13 = vector.shape_cast %12 : vector<8xf32> to vector<8x1xf32>
    %c0_14 = arith.constant 0 : index
    %c0_15 = arith.constant 0 : index
    %14 = vector.load %arg8[%c0_14, %c0_15] : memref<8x128xf32, #tpu.memory_space<vmem>>, vector<8x128xf32>
    %cst_16 = arith.constant dense<0.000000e+00> : vector<8xf32>
    %15 = vector.multi_reduction <add>, %14, %cst_16 [1] : vector<8x128xf32> to vector<8xf32>
    %16 = vector.shape_cast %15 : vector<8xf32> to vector<8x1xf32>
    %cst_17 = arith.constant 0.001953125 : f32
    %17 = vector.broadcast %cst_17 : f32 to vector<8x1xf32>
    %18 = arith.mulf %13, %17 : vector<8x1xf32>
    %cst_18 = arith.constant 0.001953125 : f32
    %19 = vector.broadcast %cst_18 : f32 to vector<8x1xf32>
    %20 = arith.mulf %16, %19 : vector<8x1xf32>
    %21 = arith.mulf %18, %18 : vector<8x1xf32>
    %22 = arith.subf %20, %21 : vector<8x1xf32>
    %cst_19 = arith.constant 0.000000e+00 : f32
    %23 = vector.broadcast %cst_19 : f32 to vector<8x1xf32>
    %24 = arith.maximumf %22, %23 : vector<8x1xf32>
    %cst_20 = arith.constant 9.99999974E-6 : f32
    %25 = vector.broadcast %cst_20 : f32 to vector<8x1xf32>
    %26 = arith.addf %24, %25 : vector<8x1xf32>
    %27 = math.rsqrt %26 : vector<8x1xf32>
    %c0_21 = arith.constant 0 : index
    %c0_22 = arith.constant 0 : index
    %28 = vector.load %arg3[%c0_21, %c0_22] : memref<8x1xf32, #tpu.memory_space<vmem>>, vector<8x1xf32>
    %29 = arith.mulf %28, %27 : vector<8x1xf32>
    %c0_23 = arith.constant 0 : index
    %c0_24 = arith.constant 0 : index
    %30 = vector.load %arg4[%c0_23, %c0_24] : memref<8x1xf32, #tpu.memory_space<vmem>>, vector<8x1xf32>
    %31 = arith.mulf %18, %29 : vector<8x1xf32>
    %32 = arith.subf %30, %31 : vector<8x1xf32>
    %c0_i32_25 = arith.constant 0 : i32
    %c2_i32_26 = arith.constant 2 : i32
    %33 = arith.addi %c0_i32_25, %c2_i32_26 : i32
    %c1_i32_27 = arith.constant 1 : i32
    scf.for %arg9 = %c0_i32_25 to %33 step %c1_i32_27  : i32 {
      %c128_i32 = arith.constant 128 : i32
      %35 = arith.muli %arg9, %c128_i32 : i32
      %36 = tpu.assume_multiple %35, 128 : i32
      %c0_33 = arith.constant 0 : index
      %c0_34 = arith.constant 0 : index
      %37 = arith.index_cast %36 : i32 to index
      %38 = vector.load %arg6[%c0_33, %c0_34, %37] : memref<2x8x256xf32, #tpu.memory_space<vmem>>, vector<1x8x128xf32>
      %39 = vector.shape_cast %38 : vector<1x8x128xf32> to vector<8x128xf32>
      %40 = vector.broadcast %29 : vector<8x1xf32> to vector<8x128xf32>
      %41 = arith.mulf %39, %40 : vector<8x128xf32>
      %42 = vector.broadcast %32 : vector<8x1xf32> to vector<8x128xf32>
      %43 = arith.addf %41, %42 : vector<8x128xf32>
      %cst_35 = arith.constant 0.000000e+00 : f32
      %44 = vector.broadcast %cst_35 : f32 to vector<8x128xf32>
      %45 = arith.maximumf %43, %44 : vector<8x128xf32>
      %c0_36 = arith.constant 0 : index
      %c0_37 = arith.constant 0 : index
      %46 = arith.index_cast %36 : i32 to index
      %47 = vector.load %arg5[%c0_36, %c0_37, %46] : memref<2x8x256xf32, #tpu.memory_space<vmem>>, vector<1x8x128xf32>
      %48 = vector.shape_cast %47 : vector<1x8x128xf32> to vector<8x128xf32>
      %49 = vector.shape_cast %45 : vector<8x128xf32> to vector<1x8x128xf32>
      tpu.vector_store %arg5[%c0_36, %c0_37, %46], %49 {strides = array<i32>} : memref<2x8x256xf32, #tpu.memory_space<vmem>>, vector<1x8x128xf32>,
    }
    %c2_i32_28 = arith.constant 2 : i32
    %c0_i32_29 = arith.constant 0 : i32
    %c2_i32_30 = arith.constant 2 : i32
    %34 = arith.addi %c0_i32_29, %c2_i32_30 : i32
    %c1_i32_31 = arith.constant 1 : i32
    scf.for %arg9 = %c0_i32_29 to %34 step %c1_i32_31  : i32 {
      %c128_i32 = arith.constant 128 : i32
      %35 = arith.muli %arg9, %c128_i32 : i32
      %36 = tpu.assume_multiple %35, 128 : i32
      %c1 = arith.constant 1 : index
      %c0_33 = arith.constant 0 : index
      %37 = arith.index_cast %36 : i32 to index
      %38 = vector.load %arg6[%c1, %c0_33, %37] : memref<2x8x256xf32, #tpu.memory_space<vmem>>, vector<1x8x128xf32>
      %39 = vector.shape_cast %38 : vector<1x8x128xf32> to vector<8x128xf32>
      %40 = vector.broadcast %29 : vector<8x1xf32> to vector<8x128xf32>
      %41 = arith.mulf %39, %40 : vector<8x128xf32>
      %42 = vector.broadcast %32 : vector<8x1xf32> to vector<8x128xf32>
      %43 = arith.addf %41, %42 : vector<8x128xf32>
      %cst_34 = arith.constant 0.000000e+00 : f32
      %44 = vector.broadcast %cst_34 : f32 to vector<8x128xf32>
      %45 = arith.maximumf %43, %44 : vector<8x128xf32>
      %c1_35 = arith.constant 1 : index
      %c0_36 = arith.constant 0 : index
      %46 = arith.index_cast %36 : i32 to index
      %47 = vector.load %arg5[%c1_35, %c0_36, %46] : memref<2x8x256xf32, #tpu.memory_space<vmem>>, vector<1x8x128xf32>
      %48 = vector.shape_cast %47 : vector<1x8x128xf32> to vector<8x128xf32>
      %49 = vector.shape_cast %45 : vector<8x128xf32> to vector<1x8x128xf32>
      tpu.vector_store %arg5[%c1_35, %c0_36, %46], %49 {strides = array<i32>} : memref<2x8x256xf32, #tpu.memory_space<vmem>>, vector<1x8x128xf32>,
    }
    %c2_i32_32 = arith.constant 2 : i32
    return
  }
  func.func @transform_0(%arg0: i32) -> (i32, i32, i32) {
    %c0_i32 = arith.constant 0 : i32
    %c0_i32_0 = arith.constant 0 : i32
    %c0_i32_1 = arith.constant 0 : i32
    %c0_i32_2 = arith.constant 0 : i32
    return %c0_i32, %c0_i32_0, %c0_i32_1 : i32, i32, i32
  }
  func.func @transform_1(%arg0: i32) -> (i32, i32) {
    %c0_i32 = arith.constant 0 : i32
    %c0_i32_0 = arith.constant 0 : i32
    %c0_i32_1 = arith.constant 0 : i32
    return %c0_i32, %c0_i32_0 : i32, i32
  }
  func.func @transform_2(%arg0: i32) -> (i32, i32) {
    %c0_i32 = arith.constant 0 : i32
    %c0_i32_0 = arith.constant 0 : i32
    %c0_i32_1 = arith.constant 0 : i32
    return %c0_i32, %c0_i32_0 : i32, i32
  }
  func.func @transform_3(%arg0: i32) -> (i32, i32) {
    %c0_i32 = arith.constant 0 : i32
    %c0_i32_0 = arith.constant 0 : i32
    %c0_i32_1 = arith.constant 0 : i32
    return %c0_i32, %c0_i32_0 : i32, i32
  }
  func.func @transform_4(%arg0: i32) -> (i32, i32, i32) {
    %c0_i32 = arith.constant 0 : i32
    %c0_i32_0 = arith.constant 0 : i32
    %c0_i32_1 = arith.constant 0 : i32
    %c0_i32_2 = arith.constant 0 : i32
    return %c0_i32, %c0_i32_0, %c0_i32_1 : i32, i32, i32
  }
}

</mosaic_0001>

<bundles_post_ra>
// kernel: convbnrelu_forward.1
= control target key start
LH: loop header
LB: loop body
LE: loop exit
PB: predicated region body
PF: predicated region fallthrough
CT: control target
= control target key end

     0   :  { %v354_v1 = vmov 0.0   ;;  %s395_s17 = smov 0   ;;  %s439_s0 = inlined_call_operand.vmem [shape: f32[2,4,256], index: 0, kind: input, shape index: {}]   ;;  %s440_s1 = inlined_call_operand.vmem [shape: f32[8,4], index: 1, kind: input, shape index: {}]   ;;  %s441_s2 = inlined_call_operand.vmem [shape: f32[8,1], index: 2, kind: input, shape index: {}]   ;;  %s442_s3 = inlined_call_operand.vmem [shape: f32[8,1], index: 3, kind: input, shape index: {}]   ;;  %s443_s4 = inlined_call_operand.vmem [shape: f32[2,8,256], index: 4, kind: output, shape index: {}]  }
   0x1   :  { %v393_v0 = vld [vmem:[%s440_s1] sm:$0xff]  ;;  %18 = vst [vmem:[#allocation3] sm:$0xff] %v354_v1 }
   0x2   :  { %19 = vst [vmem:[#allocation4] sm:$0xff] %v354_v1 }
   0x3 LB: > { %v355_v2 = vmov 0   ;;  %v356_v3 = vmov 2   ;;  %v357_v4 = vmov 1   ;;  %v358_v5 = vmov 3   ;;  %s249_s1 = sshll.u32 %s340_s17, 7  ;;  %s25_s17 = sadd.s32 1, %s340_s17   ;;  %s340_s17 = sphi %s395_s17, %s25_s17  }
   0x4   : > { %308 = vset.pattern.permute.xlu0 %v355_v2  ;;  %310 = vset.pattern.permute.xlu1 %v356_v3  ;;  %s27_s18 = sshra.s32 %s249_s1, 7  ;;  %p22_p0 = scmp.ge.s32.totalorder %s25_s17, 2  }
   0x5   : > { %34 = vperm.xlu0 %308, %v393_v0   ;;  %47 = vperm.xlu1 %310, %v393_v0   ;;  %s250_s19 = sshll.u32 %s27_s18, 2  ;;  %s251_s23 = sshll.u32 %s27_s18, 3 }
   0x6   : > { %s30_s22 = scalar_lea.vmem %s439_s0, %s250_s19  ;;  %s61_s24 = scalar_lea.vmem [#allocation2], %s251_s23 }
   0x7   : > { %v31_v8 = vld [vmem:[%s30_s22] sm:$0xf]  ;;  %s411_s25 = smov (%p22_p0), 0  }
   0x8   : > { %v37_v9 = vperm.slane %v31_v8, 0  ;;  %v43_v10 = vperm.slane %v31_v8, 1  ;;  %v50_v11 = vperm.slane %v31_v8, 2  ;;  %v57_v12 = vperm.slane %v31_v8, 3  ;;  %v63_v21 = vld [vmem:[#allocation3] sm:$0xff] }
   0x9   : > { %v66_v23 = vld [vmem:[#allocation4] sm:$0xff] }
   0xd   : > { %309 = vset.pattern.permute.xlu0 %v357_v4  ;;  %311 = vset.pattern.permute.xlu1 %v358_v5 }
   0xe   : > { %40 = vperm.xlu0 %309, %v393_v0   ;;  %54 = vperm.xlu1 %311, %v393_v0  }
  0x16   : > { %312 = vset.pattern.permute.xlu0 %v358_v5 }
  0x77   : > { %v35_v6 = vpop.permute.xlu0 %34  ;;  %v48_v7 = vpop.permute.xlu1 %47 }
  0x78   : > { %v38_v15 = vmul.f32 %v37_v9, %v35_v6  ;;  %v51_v17 = vmul.f32 %v50_v11, %v48_v7 }
  0x80   : > { %v41_v13 = vpop.permute.xlu0 %40  ;;  %v55_v14 = vpop.permute.xlu1 %54 }
  0x81   : > { %v44_v16 = vmul.f32 %v43_v10, %v41_v13  ;;  %v58_v19 = vmul.f32 %v57_v12, %v55_v14 }
  0x83   : > { %v45_v18 = vadd.f32 %v44_v16, %v38_v15 }
  0x85   : > { %v52_v20 = vadd.f32 %v51_v17, %v45_v18 }
  0x87   : > { %v59_v22 = vadd.f32 %v58_v19, %v52_v20 }
  0x89   : > { %62 = vst [vmem:[%s61_s24] sm:$0xff] %v59_v22  ;;  %v64_v24 = vadd.f32 %v63_v21, %v59_v22  ;;  %v67_v25 = vmul.f32 %v59_v22, %v59_v22  ;;  %24 = sbr.rel (!%p22_p0) target bundleno = 3 (0x3), region = 72 }
  0x8b   : > { %65 = vst [vmem:[#allocation3] sm:$0xff] %v64_v24  ;;  %v68_v26 = vadd.f32 %v67_v25, %v66_v23 }
  0x8d   : > { %69 = vst [vmem:[#allocation4] sm:$0xff] %v68_v26 }
  0x8e LB: > { %v359_v27 = vmov 0   ;;  %v360_v28 = vmov 2   ;;  %v361_v29 = vmov 1   ;;  %v362_v30 = vmov 3   ;;  %s252_s26 = sshll.u32 %s344_s25, 7  ;;  %s75_s25 = sadd.s32 1, %s344_s25   ;;  %s344_s25 = sphi %s411_s25, %s75_s25  }
  0x8f   : > { %313 = vset.pattern.permute.xlu0 %v359_v27  ;;  %315 = vset.pattern.permute.xlu1 %v360_v28  ;;  %s77_s27 = sshra.s32 %s252_s26, 7  ;;  %p72_p1 = scmp.ge.s32.totalorder %s75_s25, 2  }
  0x90   : > { %85 = vperm.xlu0 %313, %v393_v0   ;;  %98 = vperm.xlu1 %315, %v393_v0   ;;  %s253_s28 = sshll.u32 %s77_s27, 2  ;;  %s255_s6 = sshll.u32 %s77_s27, 3  ;;  %v145_v7 = vld [vmem:[%s442_s3] sm:$0xff] (%p72_p1) }
  0x91   : > { %s214_s5 = scalar_lea.vmem %s439_s0, %s253_s28  ;;  %s217_s7 = scalar_lea.vmem [#allocation2], %s255_s6 }
  0x92   : > { %v254_v33 = vld [vmem:[%s214_s5 + $0x8] sm:$0xf]  ;;  %v114_v46 = vld [vmem:[#allocation3] sm:$0xff]  ;;  %s346_s11 = smov (%p72_p1), 0  }
  0x93   : > { %v88_v34 = vperm.slane %v254_v33, 0  ;;  %v94_v35 = vperm.slane %v254_v33, 1  ;;  %v101_v36 = vperm.slane %v254_v33, 2  ;;  %v108_v37 = vperm.slane %v254_v33, 3 }
  0x94   : > { %v117_v48 = vld [vmem:[#allocation4] sm:$0xff] }
  0x98   : > { %314 = vset.pattern.permute.xlu0 %v361_v29  ;;  %316 = vset.pattern.permute.xlu1 %v362_v30 }
  0x99   : > { %91 = vperm.xlu0 %314, %v393_v0   ;;  %105 = vperm.xlu1 %316, %v393_v0   ;;  %v143_v0 = vld [vmem:[%s441_s2] sm:$0xff] (%p72_p1) }
  0xa1   : > { %317 = vset.pattern.permute.xlu0 %v362_v30 }
 0x102   : > { %v86_v31 = vpop.permute.xlu0 %85  ;;  %v99_v32 = vpop.permute.xlu1 %98 }
 0x103   : > { %v89_v40 = vmul.f32 %v88_v34, %v86_v31  ;;  %v102_v42 = vmul.f32 %v101_v36, %v99_v32 }
 0x10b   : > { %v92_v38 = vpop.permute.xlu0 %91  ;;  %v106_v39 = vpop.permute.xlu1 %105 }
 0x10c   : > { %v95_v41 = vmul.f32 %v94_v35, %v92_v38  ;;  %v109_v44 = vmul.f32 %v108_v37, %v106_v39 }
 0x10e   : > { %v96_v43 = vadd.f32 %v95_v41, %v89_v40 }
 0x110   : > { %v103_v45 = vadd.f32 %v102_v42, %v96_v43 }
 0x112   : > { %v110_v47 = vadd.f32 %v109_v44, %v103_v45 }
 0x114   : > { %256 = vst [vmem:[%s217_s7 + $0x10] sm:$0xff] %v110_v47  ;;  %v115_v49 = vadd.f32 %v114_v46, %v110_v47  ;;  %v118_v50 = vmul.f32 %v110_v47, %v110_v47  ;;  %74 = sbr.rel (!%p72_p1) target bundleno = 142 (0x8e), region = 83 }
 0x116   : > { %116 = vst [vmem:[#allocation3] sm:$0xff] %v115_v49  ;;  %v119_v51 = vadd.f32 %v118_v50, %v117_v48 }
 0x118   : > { %120 = vst [vmem:[#allocation4] sm:$0xff] %v119_v51 }
 0x11d   :  { %v121_v52 = vld [vmem:[#allocation3] sm:$0xff] }
 0x11e   :  { %122 = vadd.xlane.f32.xlu0 %v121_v52 }
 0x11f   :  { %v124_v53 = vld [vmem:[#allocation4] sm:$0xff] }
 0x126   :  { %125 = vadd.xlane.f32.xlu0 %v124_v53 }
 0x191   :  { %v123_v54 = vpop.xlane.xlu0 %122 }
 0x192   :  { %v127_v55 = vmul.f32 0.001953125, %v123_v54 }
 0x194   :  { %v129_v57 = vmul.f32 %v127_v55, %v127_v55 }
 0x199   :  { %v126_v56 = vpop.xlane.xlu0 %125 }
 0x19a   :  { %v128_v58 = vmul.f32 0.001953125, %v126_v56 }
 0x19c   :  { %v130_v59 = vsub.f32 %v128_v58, %v129_v57 }
 0x19e   :  { %v131_v60 = vmax.f32 %v130_v59, 0.0 }
 0x1a0   :  { %v132_v61 = vadd.f32 1e-05, %v131_v60 }
 0x1a2   :  { %318 = vrsqrt.f32 %v132_v61  ;;  %vm139_vm1 = vweird.f32 %v132_v61 }
 0x1a8   :  { %v319_v62 = vpop.eup %318 }
 0x1a9   :  { %v134_v63 = vmul.f32 %v319_v62, %v132_v61  ;;  %vm140_vm0 = vweird.f32 %v319_v62 }
 0x1aa   :  { %vm141_vm2 = vmor %vm139_vm1, %vm140_vm0 }
 0x1ab   :  { %v135_v1 = vmul.f32 %v319_v62, %v134_v63 }
 0x1ad   :  { %v136_v2 = vmul.f32 0.5, %v135_v1 }
 0x1af   :  { %v137_v3 = vsub.f32 1.5, %v136_v2 }
 0x1b1   :  { %v138_v4 = vmul.f32 %v319_v62, %v137_v3 }
 0x1b3   :  { %v142_v5 = vsel %vm141_vm2, %v319_v62, %v138_v4 }
 0x1b4   :  { %v144_v6 = vmul.f32 %v143_v0, %v142_v5 }
 0x1b6   :  { %v146_v8 = vmul.f32 %v144_v6, %v127_v55 }
 0x1b8   :  { %v147_v9 = vsub.f32 %v145_v7, %v146_v8 }
 0x1b9 LB: > { %v363_v10 = vmov 0   ;;  %s257_s2 = sshll.u32 %s348_s11, 7  ;;  %s153_s11 = sadd.s32 1, %s348_s11   ;;  %s348_s11 = sphi %s346_s11, %s153_s11  }
 0x1ba   : > { %320 = vset.pattern.permute.xlu0 %v363_v10  ;;  %s155_s12 = sshra.s32 %s257_s2, 7  ;;  %p150_p2 = scmp.ge.s32.totalorder %s153_s11, 2  }
 0x1bb   : > { %162 = vperm.xlu0 %320, %v144_v6   ;;  %s258_s13 = sshll.u32 %s155_s12, 3  ;;  %s350_s17 = smov (%p150_p2), 0  }
 0x1bc   : > { %s158_s14 = scalar_lea.vmem [#allocation2], %s258_s13  ;;  %s174_s16 = scalar_lea.vmem %s443_s4, %s258_s13 }
 0x1bd   : > { %v159_v12 = vld [vmem:[%s158_s14] sm:$0xff] }
 0x1c3   : > { %168 = vperm.xlu0 %320, %v147_v9  }
 0x22d   : > { %v163_v11 = vpop.permute.xlu0 %162 }
 0x22e   : > { %v165_v13 = vmul.f32 %v163_v11, %v159_v12 }
 0x235   : > { %v169_v14 = vpop.permute.xlu0 %168 }
 0x236   : > { %v171_v15 = vadd.f32 %v169_v14, %v165_v13  ;;  %152 = sbr.rel (!%p150_p2) target bundleno = 441 (0x1b9), region = 94 }
 0x238   : > { %v172_v16 = vmax.f32 %v171_v15, 0.0 }
 0x23a   : > { %175 = vst [vmem:[%s174_s16] sm:$0xff] %v172_v16 }
 0x23b LB: > { %v364_v17 = vmov 0   ;;  %s260_s1 = sshll.u32 %s352_s17, 7  ;;  %s181_s17 = sadd.s32 1, %s352_s17   ;;  %s352_s17 = sphi %s350_s17, %s181_s17  }
 0x23c   : > { %321 = vset.pattern.permute.xlu0 %v364_v17  ;;  %s183_s18 = sshra.s32 %s260_s1, 7  ;;  %p178_p3 = scmp.ge.s32.totalorder %s181_s17, 2  }
 0x23d   : > { %191 = vperm.xlu0 %321, %v144_v6   ;;  %s261_s19 = sshll.u32 %s183_s18, 3 }
 0x23e   : > { %s224_s20 = scalar_lea.vmem [#allocation2], %s261_s19  ;;  %s227_s23 = scalar_lea.vmem %s443_s4, %s261_s19 }
 0x23f   : > { %v262_v19 = vld [vmem:[%s224_s20 + $0x10] sm:$0xff] }
 0x245   : > { %197 = vperm.xlu0 %321, %v147_v9  }
 0x2af   : > { %v192_v18 = vpop.permute.xlu0 %191 }
 0x2b0   : > { %v194_v20 = vmul.f32 %v262_v19, %v192_v18 }
 0x2b7   : > { %v198_v21 = vpop.permute.xlu0 %197 }
 0x2b8   : > { %v200_v22 = vadd.f32 %v198_v21, %v194_v20  ;;  %180 = sbr.rel (!%p178_p3) target bundleno = 571 (0x23b), region = 105 }
 0x2ba   : > { %v201_v23 = vmax.f32 %v200_v22, 0.0 }
 0x2bc   : > { %264 = vst [vmem:[%s227_s23 + $0x10] sm:$0xff] %v201_v23 }

</bundles_post_ra>
